<compile_context>
chip_gen: v6e
topology: v6e:2x2x1
jax: 0.10.0
libtpu: 0.0.40
codegen_flags: <defaults>
</compile_context>

<pallas_src>
import jax
import jax.numpy as jnp
from jax.experimental import pallas as pl
from jax.experimental.pallas import tpu as pltpu

HAND_DIM = 21 * 3   # 63, as in the module
LANE = 128
SUBLANE = 8


def _round_up(x, m):
    return (x + m - 1) // m * m


def _pad_to(x, shape):
    pads = [(0, t - s) for s, t in zip(x.shape, shape)]
    return jnp.pad(x, pads)


def _choose_k_tiling(pixel_dim, max_block_k=4096):
    """Pick (tk, k_pad): tk is a multiple of 128 dividing k_pad >= pixel_dim,
    preferring k_pad == pixel_dim so the activation needs no padding pass."""
    k_pad = _round_up(pixel_dim, LANE)
    n = k_pad // LANE
    best = 1
    for m in range(1, min(n, max_block_k // LANE) + 1):
        if n % m == 0:
            best = m
    tk = best * LANE
    # Degenerate factorisation (e.g. prime number of 128-lane groups): accept a
    # small K pad so the streaming DMA blocks stay large.
    if tk < 1024 and pixel_dim > 8 * 1024:
        tk = min(2048, max_block_k)
        k_pad = _round_up(pixel_dim, tk)
    return tk, k_pad


# --------------------------------------------------------------------------
# Kernels.  Grid = (batch_tiles, k_tiles); axis 1 is the pixel-dim reduction.
# --------------------------------------------------------------------------

def _head_collapsed_kernel(px_ref, hand_ref, wpx_ref, whand_ref, b_ref,
                           out_ref, acc_ref):
    """logits = px @ W_px + hand @ W_hand + b_tot   (W_px = Wv@Wfv@Wc)."""
    k = pl.program_id(1)

    @pl.when(k == 0)
    def _init():
        # Fold the fused bias into the accumulator init.
        acc_ref[...] = jnp.broadcast_to(b_ref[...], acc_ref.shape)

    # Streaming GEMM over the flattened-pixel dim: f32 tile cast to bf16 in
    # registers, f32 accumulation on the MXU.
    acc_ref[...] += jnp.dot(px_ref[...].astype(wpx_ref.dtype), wpx_ref[...],
                            preferred_element_type=jnp.float32)

    @pl.when(k == pl.num_programs(1) - 1)
    def _finalize():
        out_ref[...] = (acc_ref[...]
                        + jnp.dot(hand_ref[...], whand_ref[...],
                                  preferred_element_type=jnp.float32)
                        ).astype(out_ref.dtype)


def _head_split_kernel(px_ref, hand_ref, wv_ref, w2_ref, whand_ref, b_ref,
                       out_ref, acc_ref):
    """logits = (px @ Wv) @ W2 + hand @ W_hand + b_tot   (W2 = Wfv@Wc).

    Used when hidden < round_up(num_labels, 128): the streamed weight stays the
    narrow (K, hidden) Wv instead of being inflated to 128 lanes."""
    k = pl.program_id(1)

    @pl.when(k == 0)
    def _init():
        acc_ref[...] = jnp.zeros_like(acc_ref)

    acc_ref[...] += jnp.dot(px_ref[...].astype(wv_ref.dtype), wv_ref[...],
                            preferred_element_type=jnp.float32)

    @pl.when(k == pl.num_programs(1) - 1)
    def _finalize():
        logits = (jnp.dot(acc_ref[...], w2_ref[...],
                          preferred_element_type=jnp.float32)
                  + jnp.dot(hand_ref[...], whand_ref[...],
                            preferred_element_type=jnp.float32)
                  + b_ref[...])
        out_ref[...] = logits.astype(out_ref.dtype)


# --------------------------------------------------------------------------
# One-time parameter preparation (cache the result; do NOT call per forward).
# --------------------------------------------------------------------------

def prepare_hybrid_params(params, *, weight_dtype=jnp.bfloat16, max_block_k=4096):
    """Collapse + cast + pad the linear chain once.

    logits = px @ (Wv @ Wfv @ Wc) + hand @ (Wfh @ Wc) + ((bv@Wfv + bf)@Wc + bc)
    (exact: there is no nonlinearity between the three Linear layers)."""
    wv, bv, wfv, wfh, bf, wc, bc = params
    pixel_dim, hidden = wv.shape
    hand_dim = wfh.shape[0]
    num_labels = wc.shape[1]

    l_pad = _round_up(num_labels, LANE)
    hand_pad = _round_up(hand_dim, LANE)
    tk, k_pad = _choose_k_tiling(pixel_dim, max_block_k)

    # Re-associated collapse: small (H,L) product first, then one K*H*L GEMM.
    w2 = wfv @ wc                                   # (H, L)
    w_hand = wfh @ wc                               # (hand_dim, L)
    b_tot = (bv @ wfv + bf) @ wc + bc               # (1, L)

    collapsed = l_pad <= hidden
    if collapsed:
        # Stream (K, l_pad) bf16 — narrower than (K, hidden).
        w_stream = _pad_to((wv @ w2).astype(weight_dtype), (k_pad, l_pad))
        w2_p = None
    else:
        # hidden < 128: collapsing would inflate the dominant stream to 128
        # lanes.  Stream the narrow (K, hidden) Wv; apply W2 in finalize.
        w_stream = _pad_to(wv.astype(weight_dtype), (k_pad, hidden))
        w2_p = w2.astype(jnp.float32)
    # TODO(synk): optional int8 (v5e/v6e) / fp8 (v7x) quantization of w_stream
    # would halve the dominant HBM stream; needs accuracy validation.

    return dict(
        collapsed=collapsed,
        pixel_dim=pixel_dim, hidden=hidden, num_labels=num_labels,
        l_pad=l_pad, hand_pad=hand_pad, tk=tk, k_pad=k_pad,
        w_stream=w_stream,
        w2=w2_p,
        w_hand=_pad_to(w_hand.astype(jnp.float32), (hand_pad, l_pad)),
        bias=_pad_to(b_tot.astype(jnp.float32), (1, l_pad)),
    )


# --------------------------------------------------------------------------
# Forward pass (per-call hot path).
# --------------------------------------------------------------------------

def hybrid_model_forward(pixel_values, hand_features, prepared, labels=None):
    """pixel_values: (B, C, H, W); hand_features: (B, 63).
    Returns f32 logits of shape (B, num_labels).  `labels` is accepted for
    parity with the torch module's signature but unused (module returns logits)."""
    del labels
    p = prepared
    B = pixel_values.shape[0]
    px = pixel_values.reshape(B, -1)                 # (B, K) contiguous view
    assert px.shape[1] == p["pixel_dim"]

    tb = 256 if B > 256 else _round_up(B, 16)        # 16-row (bf16) sublane pack
    b_pad = _round_up(B, tb)

    # Pixels stay in their stored dtype (f32) and are cast to bf16 inside the
    # kernel: no separate cast pass over the activation.  Pad only if needed.
    if (b_pad, p["k_pad"]) != px.shape:
        px = _pad_to(px, (b_pad, p["k_pad"]))
    hand = _pad_to(hand_features.astype(jnp.float32), (b_pad, p["hand_pad"]))

    tk, l_pad, hand_pad = p["tk"], p["l_pad"], p["hand_pad"]
    grid = (b_pad // tb, p["k_pad"] // tk)

    compiler_params = pltpu.CompilerParams(
        dimension_semantics=("parallel", "arbitrary"),
        vmem_limit_bytes=32 * 1024 * 1024)
    # NOTE: on v5e/v6e (128 MiB VMEM) one could instead pin the whole streamed
    # weight resident to avoid per-batch-tile re-streaming; the streaming plan
    # is kept here because it also fits v7x's 64 MiB VMEM.

    if p["collapsed"]:
        out = pl.pallas_call(
            _head_collapsed_kernel,
            out_shape=jax.ShapeDtypeStruct((b_pad, l_pad), jnp.float32),
            grid=grid,
            in_specs=[
                pl.BlockSpec((tb, tk), lambda i, k: (i, k)),           # px (streams)
                pl.BlockSpec((tb, hand_pad), lambda i, k: (i, 0)),     # hand
                pl.BlockSpec((tk, l_pad), lambda i, k: (k, 0)),        # W_px (streams)
                pl.BlockSpec((hand_pad, l_pad), lambda i, k: (0, 0)),  # W_hand
                pl.BlockSpec((1, l_pad), lambda i, k: (0, 0)),         # bias
            ],
            out_specs=pl.BlockSpec((tb, l_pad), lambda i, k: (i, 0)),
            scratch_shapes=[pltpu.VMEM((tb, l_pad), jnp.float32)],
            compiler_params=compiler_params,
        )(px, hand, p["w_stream"], p["w_hand"], p["bias"])
    else:
        hidden = p["hidden"]
        out = pl.pallas_call(
            _head_split_kernel,
            out_shape=jax.ShapeDtypeStruct((b_pad, l_pad), jnp.float32),
            grid=grid,
            in_specs=[
                pl.BlockSpec((tb, tk), lambda i, k: (i, k)),           # px (streams)
                pl.BlockSpec((tb, hand_pad), lambda i, k: (i, 0)),     # hand
                pl.BlockSpec((tk, hidden), lambda i, k: (k, 0)),       # Wv (streams)
                pl.BlockSpec((hidden, l_pad), lambda i, k: (0, 0)),    # W2
                pl.BlockSpec((hand_pad, l_pad), lambda i, k: (0, 0)),  # W_hand
                pl.BlockSpec((1, l_pad), lambda i, k: (0, 0)),         # bias
            ],
            out_specs=pl.BlockSpec((tb, l_pad), lambda i, k: (i, 0)),
            scratch_shapes=[pltpu.VMEM((tb, hidden), jnp.float32)],
            compiler_params=compiler_params,
        )(px, hand, p["w_stream"], p["w2"], p["w_hand"], p["bias"])

    return out[:B, :p["num_labels"]]


def make_params(key, pixel_dim, hidden_size, hand_dim, num_labels):
    ks = jax.random.split(key, 7)
    scale = 0.02
    wv = scale * jax.random.normal(ks[0], (pixel_dim, hidden_size), jnp.float32)
    bv = scale * jax.random.normal(ks[1], (1, hidden_size), jnp.float32)
    # fusion_layer weight is (hidden + hand_dim, hidden); kept as two blocks
    wfv = scale * jax.random.normal(ks[2], (hidden_size, hidden_size), jnp.float32)
    wfh = scale * jax.random.normal(ks[3], (hand_dim, hidden_size), jnp.float32)
    bf = scale * jax.random.normal(ks[4], (1, hidden_size), jnp.float32)
    wc = scale * jax.random.normal(ks[5], (hidden_size, num_labels), jnp.float32)
    bc = scale * jax.random.normal(ks[6], (1, num_labels), jnp.float32)
    return (wv, bv, wfv, wfh, bf, wc, bc)


if __name__ == "__main__":
    key = jax.random.PRNGKey(0)
    B, C, Himg, Wimg = 2, 3, 16, 16
    hand_dim = HAND_DIM            # 63
    num_labels = 5

    k_px, k_hand, k_p1, k_p2 = jax.random.split(key, 4)
    pixel_values = jax.random.normal(k_px, (B, C, Himg, Wimg), jnp.float32)
    hand_features = jax.random.normal(k_hand, (B, hand_dim), jnp.float32)
    labels = jnp.zeros((B,), jnp.int32)   # unused by forward (logits only)

    def reference(params):
        # pure-JAX f32 reference of the original (uncollapsed) module math
        wv, bv, wfv, wfh, bf, wc, bc = params
        px_flat = pixel_values.reshape(B, -1)
        vis = px_flat @ wv + bv
        cat = jnp.concatenate([vis, hand_features], axis=1)
        wf_full = jnp.concatenate([wfv, wfh], axis=0)
        return (cat @ wf_full + bf) @ wc + bc

    # hidden=64 exercises the narrow-stream (split) path; hidden=128 the
    # fully-collapsed path.
    for hidden_size, kp, expect_collapsed in ((64, k_p1, False), (128, k_p2, True)):
        params = make_params(kp, C * Himg * Wimg, hidden_size, hand_dim,
                             num_labels)
        prepared = prepare_hybrid_params(params)
        assert prepared["collapsed"] == expect_collapsed
        logits = hybrid_model_forward(pixel_values, hand_features, prepared,
                                      labels)
        jax.block_until_ready(logits)
        ref = reference(params)
        assert logits.shape == (B, num_labels)
        # bf16 streamed weights + in-register bf16 pixel cast, f32 accumulation
        assert jnp.allclose(logits, ref, atol=1e-2, rtol=1e-2), (
            hidden_size, float(jnp.max(jnp.abs(logits - ref))))

    print("KERNEL_OK")
</pallas_src>

<mosaic_0001>
module attributes {stable_mosaic.version = 11 : i64} {
  func.func @_head_split_kernel(%arg0: i32, %arg1: i32, %arg2: memref<16x768xf32, #tpu.memory_space<vmem>>, %arg3: memref<16x128xf32, #tpu.memory_space<vmem>>, %arg4: memref<768x64xbf16, #tpu.memory_space<vmem>>, %arg5: memref<64x128xf32, #tpu.memory_space<vmem>>, %arg6: memref<128x128xf32, #tpu.memory_space<vmem>>, %arg7: memref<1x128xf32, #tpu.memory_space<vmem>>, %arg8: memref<16x128xf32, #tpu.memory_space<vmem>>, %arg9: memref<16x64xf32, #tpu.memory_space<vmem>>) attributes {dimension_semantics = [#tpu.dimension_semantics<parallel>, #tpu.dimension_semantics<arbitrary>], iteration_bounds = array<i64: 1, 1>, scalar_prefetch = 0 : i64, scratch_operands = 1 : i64, tpu.core_type = #tpu.core_type<tc>, window_params = [{transform_indices = @transform_0, window_bounds = array<i64: 16, 768>}, {transform_indices = @transform_1, window_bounds = array<i64: 16, 128>}, {transform_indices = @transform_2, window_bounds = array<i64: 768, 64>}, {transform_indices = @transform_3, window_bounds = array<i64: 64, 128>}, {pipeline_mode = #tpu.pipeline_mode<synchronous>, transform_indices = @transform_4, window_bounds = array<i64: 128, 128>}, {pipeline_mode = #tpu.pipeline_mode<synchronous>, transform_indices = @transform_5, window_bounds = array<i64: 1, 128>}, {transform_indices = @transform_6, window_bounds = array<i64: 16, 128>}]} {
    %c0_i32 = arith.constant 0 : i32
    %0 = arith.cmpi eq, %arg1, %c0_i32 : i32
    %1 = arith.extui %0 : i1 to i32
    %c0_i32_0 = arith.constant 0 : i32
    %2 = arith.cmpi ne, %1, %c0_i32_0 : i32
    scf.if %2 {
      %cst_10 = arith.constant 0.000000e+00 : f32
      %13 = vector.broadcast %cst_10 : f32 to vector<16x64xf32>
      %c0_11 = arith.constant 0 : index
      %c0_12 = arith.constant 0 : index
      %14 = vector.load %arg9[%c0_11, %c0_12] : memref<16x64xf32, #tpu.memory_space<vmem>>, vector<16x64xf32>
      tpu.vector_store %arg9[%c0_11, %c0_12], %13 {strides = array<i32>} : memref<16x64xf32, #tpu.memory_space<vmem>>, vector<16x64xf32>,
    } else {
    }
    %c0 = arith.constant 0 : index
    %c0_1 = arith.constant 0 : index
    %3 = vector.load %arg9[%c0, %c0_1] : memref<16x64xf32, #tpu.memory_space<vmem>>, vector<16x64xf32>
    %c0_2 = arith.constant 0 : index
    %c0_3 = arith.constant 0 : index
    %4 = vector.load %arg2[%c0_2, %c0_3] : memref<16x768xf32, #tpu.memory_space<vmem>>, vector<16x768xf32>
    %5 = arith.truncf %4 : vector<16x768xf32> to vector<16x768xbf16>
    %c0_4 = arith.constant 0 : index
    %c0_5 = arith.constant 0 : index
    %6 = vector.load %arg4[%c0_4, %c0_5] : memref<768x64xbf16, #tpu.memory_space<vmem>>, vector<768x64xbf16>
    %cst = arith.constant dense<0.000000e+00> : vector<16x64xf32>
    %7 = tpu.matmul %5, %6, %cst {dimension_numbers = #tpu.dot_dimension_numbers<[1], [0], [0], [1], [0, 0, 1, 1], [], []>} : vector<16x768xbf16>, vector<768x64xbf16>, vector<16x64xf32> -> vector<16x64xf32>
    %8 = arith.addf %3, %7 : vector<16x64xf32>
    %c0_6 = arith.constant 0 : index
    %c0_7 = arith.constant 0 : index
    %9 = vector.load %arg9[%c0_6, %c0_7] : memref<16x64xf32, #tpu.memory_space<vmem>>, vector<16x64xf32>
    tpu.vector_store %arg9[%c0_6, %c0_7], %8 {strides = array<i32>} : memref<16x64xf32, #tpu.memory_space<vmem>>, vector<16x64xf32>,
    %c0_i32_8 = arith.constant 0 : i32
    %10 = arith.cmpi eq, %arg1, %c0_i32_8 : i32
    %11 = arith.extui %10 : i1 to i32
    %c0_i32_9 = arith.constant 0 : i32
    %12 = arith.cmpi ne, %11, %c0_i32_9 : i32
    scf.if %12 {
      %c0_10 = arith.constant 0 : index
      %c0_11 = arith.constant 0 : index
      %13 = vector.load %arg9[%c0_10, %c0_11] : memref<16x64xf32, #tpu.memory_space<vmem>>, vector<16x64xf32>
      %c0_12 = arith.constant 0 : index
      %c0_13 = arith.constant 0 : index
      %14 = vector.load %arg5[%c0_12, %c0_13] : memref<64x128xf32, #tpu.memory_space<vmem>>, vector<64x128xf32>
      %cst_14 = arith.constant dense<0.000000e+00> : vector<16x128xf32>
      %15 = tpu.matmul %13, %14, %cst_14 {dimension_numbers = #tpu.dot_dimension_numbers<[1], [0], [0], [1], [0, 0, 1, 1], [], []>} : vector<16x64xf32>, vector<64x128xf32>, vector<16x128xf32> -> vector<16x128xf32>
      %c0_15 = arith.constant 0 : index
      %c0_16 = arith.constant 0 : index
      %16 = vector.load %arg3[%c0_15, %c0_16] : memref<16x128xf32, #tpu.memory_space<vmem>>, vector<16x128xf32>
      %c0_17 = arith.constant 0 : index
      %c0_18 = arith.constant 0 : index
      %17 = vector.load %arg6[%c0_17, %c0_18] : memref<128x128xf32, #tpu.memory_space<vmem>>, vector<128x128xf32>
      %cst_19 = arith.constant dense<0.000000e+00> : vector<16x128xf32>
      %18 = tpu.matmul %16, %17, %cst_19 {dimension_numbers = #tpu.dot_dimension_numbers<[1], [0], [0], [1], [0, 0, 1, 1], [], []>} : vector<16x128xf32>, vector<128x128xf32>, vector<16x128xf32> -> vector<16x128xf32>
      %19 = arith.addf %15, %18 : vector<16x128xf32>
      %c0_20 = arith.constant 0 : index
      %c0_21 = arith.constant 0 : index
      %20 = vector.load %arg7[%c0_20, %c0_21] : memref<1x128xf32, #tpu.memory_space<vmem>>, vector<1x128xf32>
      %21 = vector.broadcast %20 : vector<1x128xf32> to vector<16x128xf32>
      %22 = arith.addf %19, %21 : vector<16x128xf32>
      %c0_22 = arith.constant 0 : index
      %c0_23 = arith.constant 0 : index
      %23 = vector.load %arg8[%c0_22, %c0_23] : memref<16x128xf32, #tpu.memory_space<vmem>>, vector<16x128xf32>
      tpu.vector_store %arg8[%c0_22, %c0_23], %22 {strides = array<i32>} : memref<16x128xf32, #tpu.memory_space<vmem>>, vector<16x128xf32>,
    } else {
    }
    return
  }
  func.func @transform_0(%arg0: i32, %arg1: i32) -> (i32, i32) {
    %c0_i32 = arith.constant 0 : i32
    return %arg0, %arg1 : i32, i32
  }
  func.func @transform_1(%arg0: i32, %arg1: i32) -> (i32, i32) {
    %c0_i32 = arith.constant 0 : i32
    %c0_i32_0 = arith.constant 0 : i32
    return %arg0, %c0_i32 : i32, i32
  }
  func.func @transform_2(%arg0: i32, %arg1: i32) -> (i32, i32) {
    %c0_i32 = arith.constant 0 : i32
    %c0_i32_0 = arith.constant 0 : i32
    return %arg1, %c0_i32 : i32, i32
  }
  func.func @transform_3(%arg0: i32, %arg1: i32) -> (i32, i32) {
    %c0_i32 = arith.constant 0 : i32
    %c0_i32_0 = arith.constant 0 : i32
    %c0_i32_1 = arith.constant 0 : i32
    return %c0_i32, %c0_i32_0 : i32, i32
  }
  func.func @transform_4(%arg0: i32, %arg1: i32) -> (i32, i32) {
    %c0_i32 = arith.constant 0 : i32
    %c0_i32_0 = arith.constant 0 : i32
    %c0_i32_1 = arith.constant 0 : i32
    return %c0_i32, %c0_i32_0 : i32, i32
  }
  func.func @transform_5(%arg0: i32, %arg1: i32) -> (i32, i32) {
    %c0_i32 = arith.constant 0 : i32
    %c0_i32_0 = arith.constant 0 : i32
    %c0_i32_1 = arith.constant 0 : i32
    return %c0_i32, %c0_i32_0 : i32, i32
  }
  func.func @transform_6(%arg0: i32, %arg1: i32) -> (i32, i32) {
    %c0_i32 = arith.constant 0 : i32
    %c0_i32_0 = arith.constant 0 : i32
    return %arg0, %c0_i32 : i32, i32
  }
}

</mosaic_0001>

<bundles_post_ra>
// kernel: tpu_custom_call.1
= control target key start
LH: loop header
LB: loop body
LE: loop exit
PB: predicated region body
PF: predicated region fallthrough
CT: control target
= control target key end

     0   :  { %s1360_s0 = inlined_call_operand.vmem [shape: f32[16,768], index: 0, kind: input, shape index: {}]   ;;  %s1361_s1 = inlined_call_operand.vmem [shape: f32[16,128], index: 1, kind: input, shape index: {}]   ;;  %s1362_s2 = inlined_call_operand.vmem [shape: bf16[768,64], index: 2, kind: input, shape index: {}]   ;;  %s1363_s3 = inlined_call_operand.vmem [shape: f32[64,5], index: 3, kind: input, shape index: {}]   ;;  %s1364_s4 = inlined_call_operand.vmem [shape: f32[128,128], index: 4, kind: input, shape index: {}]   ;;  %s1365_s5 = inlined_call_operand.vmem [shape: f32[1,128], index: 5, kind: input, shape index: {}]   ;;  %s1366_s6 = inlined_call_operand.hbm [shape: f32[16,128], index: 6, kind: output, shape index: {}]  }
   0x1   :  { %v981_v0 = vld [vmem:[%s1362_s2 + $0x78] sm:$0xff]   ;;  %v985_v4 = vld [vmem:[%s1362_s2 + $0x70] sm:$0xff]   ;;  %v989_v8 = vld [vmem:[%s1362_s2 + $0x68] sm:$0xff]  }
   0x2   :  { %v982_v1 = vld [vmem:[%s1362_s2 + $0xf8] sm:$0xff]   ;;  %829 = vmatprep.subr.bf16.mxu0 %v981_v0  ;;  %v986_v5 = vld [vmem:[%s1362_s2 + $0xf0] sm:$0xff]   ;;  %v990_v9 = vld [vmem:[%s1362_s2 + $0xe8] sm:$0xff]  }
   0x3   :  { %v983_v2 = vld [vmem:[%s1362_s2 + $0x38] sm:$0xff]   ;;  %851 = vmatprep.subr.bf16.mxu1 %v982_v1  ;;  %v987_v6 = vld [vmem:[%s1362_s2 + $0x30] sm:$0xff]   ;;  %v991_v10 = vld [vmem:[%s1362_s2 + $0x28] sm:$0xff]  }
   0x4   :  { %v984_v3 = vld [vmem:[%s1362_s2 + $0xb8] sm:$0xff]   ;;  %830 = vmatpush3.bf16.msra.mxu0 %v983_v2  ;;  %v988_v7 = vld [vmem:[%s1362_s2 + $0xb0] sm:$0xff]   ;;  %v992_v11 = vld [vmem:[%s1362_s2 + $0xa8] sm:$0xff]  }
   0x5   :  { %852 = vmatpush3.bf16.msra.mxu1 %v984_v3  ;;  %831 = vmatprep.subr.bf16.mxu0 %v985_v4  ;;  %v993_v12 = vld [vmem:[%s1362_s2 + $0x60] sm:$0xff]   ;;  %v997_v16 = vld [vmem:[%s1362_s2 + $0x58] sm:$0xff]   ;;  %v1001_v20 = vld [vmem:[%s1362_s2 + $0x50] sm:$0xff]  }
   0x6   :  { %853 = vmatprep.subr.bf16.mxu1 %v986_v5  ;;  %v994_v13 = vld [vmem:[%s1362_s2 + $0xe0] sm:$0xff]   ;;  %v998_v17 = vld [vmem:[%s1362_s2 + $0xd8] sm:$0xff]   ;;  %v1002_v21 = vld [vmem:[%s1362_s2 + $0xd0] sm:$0xff]  }
   0x7   :  { %v995_v14 = vld [vmem:[%s1362_s2 + $0x20] sm:$0xff]   ;;  %v999_v18 = vld [vmem:[%s1362_s2 + $0x18] sm:$0xff]   ;;  %v1003_v22 = vld [vmem:[%s1362_s2 + $0x10] sm:$0xff]  }
   0x8   :  { %832 = vmatpush3.bf16.msra.mxu0 %v987_v6  ;;  %v996_v15 = vld [vmem:[%s1362_s2 + $0xa0] sm:$0xff]   ;;  %v1000_v19 = vld [vmem:[%s1362_s2 + $0x98] sm:$0xff]   ;;  %v1004_v23 = vld [vmem:[%s1362_s2 + $0x90] sm:$0xff]  }
   0x9   :  { %854 = vmatpush3.bf16.msra.mxu1 %v988_v7  ;;  %833 = vmatprep.subr.bf16.mxu0 %v989_v8  ;;  %v1005_v24 = vld [vmem:[%s1362_s2 + $0x48] sm:$0xff]   ;;  %v1009_v28 = vld [vmem:[%s1362_s2 + $0x40] sm:$0xff]   ;;  %v41_v33 = vld [vmem:[%s1360_s0 + $0x38] sm:$0xff] }
   0xa   :  { %855 = vmatprep.subr.bf16.mxu1 %v990_v9  ;;  %v1006_v25 = vld [vmem:[%s1362_s2 + $0xc8] sm:$0xff]   ;;  %v1010_v29 = vld [vmem:[%s1362_s2 + $0xc0] sm:$0xff]   ;;  %v37_v34 = vld [vmem:[%s1360_s0 + $0x18] sm:$0xff] }
   0xb   :  { %v1007_v26 = vld [vmem:[%s1362_s2 + $0x8] sm:$0xff]   ;;  %v1011_v30 = vld [vmem:[%s1362_s2] sm:$0xff]   ;;  %v40_v38 = vld [vmem:[%s1360_s0 + $0x30] sm:$0xff] }
   0xc   :  { %834 = vmatpush3.bf16.msra.mxu0 %v991_v10  ;;  %v1008_v27 = vld [vmem:[%s1362_s2 + $0x88] sm:$0xff]   ;;  %v1012_v31 = vld [vmem:[%s1362_s2 + $0x80] sm:$0xff]   ;;  %v36_v41 = vld [vmem:[%s1360_s0 + $0x10] sm:$0xff] }
   0xd   :  { %856 = vmatpush3.bf16.msra.mxu1 %v992_v11  ;;  %835 = vmatprep.subr.bf16.mxu0 %v993_v12  ;;  %v35_v32 = vld [vmem:[%s1360_s0 + $0x8] sm:$0xff]  ;;  %v34_v37 = vld [vmem:[%s1360_s0] sm:$0xff]  ;;  %v1013_v44 = vld [vmem:[%s1362_s2 + $0x178] sm:$0xff]  }
   0xe   :  { %857 = vmatprep.subr.bf16.mxu1 %v994_v13  ;;  %v47_v35 = vpack.c.bf16 %v41_v33, %v35_v32  ;;  %v43_v36 = vld [vmem:[%s1360_s0 + $0x48] sm:$0xff]  ;;  %v46_v40 = vpack.c.bf16 %v40_v38, %v34_v37  ;;  %v42_v42 = vld [vmem:[%s1360_s0 + $0x40] sm:$0xff]  ;;  %v1014_v45 = vld [vmem:[%s1362_s2 + $0x138] sm:$0xff]  }
   0xf   :  { %v49_v39 = vpack.c.bf16 %v43_v36, %v37_v34  ;;  %v48_v43 = vpack.c.bf16 %v42_v42, %v36_v41  ;;  %v1015_v46 = vld [vmem:[%s1362_s2 + $0x170] sm:$0xff]   ;;  %v1017_v48 = vld [vmem:[%s1362_s2 + $0x168] sm:$0xff]   ;;  %v1019_v50 = vld [vmem:[%s1362_s2 + $0x160] sm:$0xff]  }
  0x10   :  { %836 = vmatpush3.bf16.msra.mxu0 %v995_v14  ;;  %468 = vmatprep.mubr.bf16.mxu0 %v47_v35  ;;  %v1016_v47 = vld [vmem:[%s1362_s2 + $0x130] sm:$0xff]   ;;  %v1018_v49 = vld [vmem:[%s1362_s2 + $0x128] sm:$0xff]   ;;  %v1020_v51 = vld [vmem:[%s1362_s2 + $0x120] sm:$0xff]  }
  0x11   :  { %858 = vmatpush3.bf16.msra.mxu1 %v996_v15  ;;  %837 = vmatprep.subr.bf16.mxu0 %v997_v16  ;;  %v1021_v52 = vld [vmem:[%s1362_s2 + $0x158] sm:$0xff]   ;;  %v39_v54 = vld [vmem:[%s1360_s0 + $0x28] sm:$0xff]  ;;  %v1023_v55 = vld [vmem:[%s1362_s2 + $0x150] sm:$0xff]  }
  0x12   :  { %859 = vmatprep.subr.bf16.mxu1 %v998_v17  ;;  %509 = vmatprep.mubr.bf16.mxu1 %v49_v39  ;;  %v1022_v53 = vld [vmem:[%s1362_s2 + $0x118] sm:$0xff]  }
  0x13   :  { %v45_v56 = vld [vmem:[%s1360_s0 + $0x58] sm:$0xff] }
  0x14   :  { %838 = vmatpush3.bf16.msra.mxu0 %v999_v18  ;;  %v51_v57 = vpack.c.bf16 %v45_v56, %v39_v54 }
  0x15   :  { %860 = vmatpush3.bf16.msra.mxu1 %v1000_v19  ;;  %839 = vmatprep.subr.bf16.mxu0 %v1001_v20 }
  0x16   :  { %861 = vmatprep.subr.bf16.mxu1 %v1002_v21 }
  0x18   :  { %840 = vmatpush3.bf16.msra.mxu0 %v1003_v22 }
  0x19   :  { %862 = vmatpush3.bf16.msra.mxu1 %v1004_v23  ;;  %841 = vmatprep.subr.bf16.mxu0 %v1005_v24 }
  0x1a   :  { %863 = vmatprep.subr.bf16.mxu1 %v1006_v25 }
  0x1c   :  { %842 = vmatpush3.bf16.msra.mxu0 %v1007_v26 }
  0x1d   :  { %864 = vmatpush3.bf16.msra.mxu1 %v1008_v27  ;;  %843 = vmatprep.subr.bf16.mxu0 %v1009_v28 }
  0x1e   :  { %865 = vmatprep.subr.bf16.mxu1 %v1010_v29 }
  0x20   :  { %844 = vmatpush3.bf16.msra.mxu0 %v1011_v30 }
  0x21   :  { %866 = vmatpush3.bf16.msra.mxu1 %v1012_v31  ;;  %873 = vmatprep.subr.bf16.mxu0 %v1013_v44 }
  0x23   :  { %469 = vmatmul.mubr.bf16.vlgmr.msra.gmra.mxu0 %v46_v40 }
  0x24   :  { %510 = vmatmul.mubr.bf16.vlgmr.msra.gmra.mxu1 %v48_v43  ;;  %874 = vmatpush3.bf16.msra.mxu0 %v1014_v45 }
  0x25   :  { %875 = vmatprep.subr.bf16.mxu0 %v1015_v46 }
  0x28   :  { %876 = vmatpush3.bf16.msra.mxu0 %v1016_v47 }
  0x29   :  { %877 = vmatprep.subr.bf16.mxu0 %v1017_v48 }
  0x2c   :  { %878 = vmatpush3.bf16.msra.mxu0 %v1018_v49 }
  0x2d   :  { %879 = vmatprep.subr.bf16.mxu0 %v1019_v50 }
  0x30   :  { %880 = vmatpush3.bf16.msra.mxu0 %v1020_v51 }
  0x31   :  { %881 = vmatprep.subr.bf16.mxu0 %v1021_v52 }
  0x32   :  { %11 = vsyncpa [#allocation4], 0  ;;  %v1024_v58 = vld [vmem:[%s1362_s2 + $0x110] sm:$0xff]   ;;  %550 = vmatprep.mubr.bf16.mxu0 %v51_v57  ;;  %v1025_v59 = vld [vmem:[%s1362_s2 + $0x148] sm:$0xff]   ;;  %vm29_vm0 = vcmask 523264   ;;  %v1051_v9 = vmov 0.0  }
  0x33   :  { %v1026_v60 = vld [vmem:[%s1362_s2 + $0x108] sm:$0xff]   ;;  %v1027_v61 = vld [vmem:[%s1362_s2 + $0x140] sm:$0xff]   ;;  %v44_v0 = vld [vmem:[%s1360_s0 + $0x50] sm:$0xff]  ;;  %30 = vst.msk [vmem:[#allocation2] sm:$0xff] %vm29_vm0, %v1051_v9  ;;  %s1052_s20 = smov [#allocation3]  }
  0x34   :  { %882 = vmatpush3.bf16.msra.mxu0 %v1022_v53  ;;  %v1028_v62 = vld [vmem:[%s1362_s2 + $0x100] sm:$0xff]   ;;  %v594_v2 = vld [vmem:[%s1364_s4 + $0x78] sm:$0xff]  ;;  %v593_v3 = vld [vmem:[%s1364_s4 + $0x70] sm:$0xff]  ;;  %31 = vst.msk [vmem:[#allocation2 + $0x8] sm:$0xff] %vm29_vm0, %v1051_v9  ;;  %s767_s21 = sshll.u32 %s1052_s20, 4  ;;  %s768_s21 = int_to_ptr.vmem [resolvable:$true] %s767_s21 }
  0x35   :  { %883 = vmatprep.subr.bf16.mxu0 %v1023_v55  ;;  %v38_v63 = vld [vmem:[%s1360_s0 + $0x20] sm:$0xff]  ;;  %923 = vmatprep.subr.mxu1 %v594_v2  ;;  %v592_v4 = vld [vmem:[%s1364_s4 + $0x68] sm:$0xff]  ;;  %v590_v6 = vld [vmem:[%s1364_s4 + $0x58] sm:$0xff]  ;;  %s1029_s22 = scalar_lea.vmem %s768_s21, 256  ;;  %p1034_p1 = scmp.lt.s32.totalorder %s768_s21, %s768_s21 }
  0x36   :  { %v50_v1 = vpack.c.bf16 %v44_v0, %v38_v63  ;;  %924 = vmatpush3.msra.mxu1 %v594_v2  ;;  %v591_v5 = vld [vmem:[%s1364_s4 + $0x60] sm:$0xff]  ;;  %v589_v7 = vld [vmem:[%s1364_s4 + $0x50] sm:$0xff]  ;;  %v588_v8 = vld [vmem:[%s1364_s4 + $0x48] sm:$0xff]  ;;  %p1030_p0 = scmp.ne.s32.totalorder %s768_s21, %s1029_s22  ;;  %p1035_p2 = scmp.lt.s32.totalorder %s1029_s22, %s1029_s22 }
  0x37   :  { %925 = vmatprep.subr.mxu1 %v593_v3  ;;  %v587_v10 = vld [vmem:[%s1364_s4 + $0x40] sm:$0xff]  ;;  %v586_v11 = vld [vmem:[%s1364_s4 + $0x38] sm:$0xff]  ;;  %v585_v12 = vld [vmem:[%s1364_s4 + $0x30] sm:$0xff] }
  0x38   :  { %884 = vmatpush3.bf16.msra.mxu0 %v1024_v58  ;;  %926 = vmatpush3.msra.mxu1 %v593_v3  ;;  %v576_v13 = vld [vmem:[%s1363_s3 + $0x38] sm:$0xff]  ;;  %v584_v14 = vld [vmem:[%s1364_s4 + $0x28] sm:$0xff]  ;;  %v575_v15 = vld [vmem:[%s1363_s3 + $0x30] sm:$0xff]  ;;  %p1036_p3 = por %p1035_p2, %p1034_p1 }
  0x39   :  { %885 = vmatprep.subr.bf16.mxu0 %v1025_v59  ;;  %927 = vmatprep.subr.mxu1 %v592_v4  ;;  %v583_v16 = vld [vmem:[%s1364_s4 + $0x20] sm:$0xff]  ;;  %v574_v17 = vld [vmem:[%s1363_s3 + $0x28] sm:$0xff]  ;;  %v582_v18 = vld [vmem:[%s1364_s4 + $0x18] sm:$0xff] }
  0x3a   :  { %928 = vmatpush3.msra.mxu1 %v592_v4  ;;  %v573_v19 = vld [vmem:[%s1363_s3 + $0x20] sm:$0xff]  ;;  %v581_v20 = vld [vmem:[%s1364_s4 + $0x10] sm:$0xff]  ;;  %v572_v21 = vld [vmem:[%s1363_s3 + $0x18] sm:$0xff]  ;;  %p1037_p4 = pnand %p1036_p3, %p1030_p0 }
  0x3b   :  { %929 = vmatprep.subr.mxu1 %v591_v5  ;;  %v580_v22 = vld [vmem:[%s1364_s4 + $0x8] sm:$0xff]  ;;  %v571_v23 = vld [vmem:[%s1363_s3 + $0x10] sm:$0xff]  ;;  %v579_v24 = vld [vmem:[%s1364_s4] sm:$0xff] }
  0x3c   :  { %886 = vmatpush3.bf16.msra.mxu0 %v1026_v60  ;;  %930 = vmatpush3.msra.mxu1 %v591_v5  ;;  %v570_v25 = vld [vmem:[%s1363_s3 + $0x8] sm:$0xff]  ;;  %v577_v26 = vld [vmem:[%s1361_s1] sm:$0xff] }
  0x3d   :  { %887 = vmatprep.subr.bf16.mxu0 %v1027_v61  ;;  %931 = vmatprep.subr.mxu1 %v590_v6  ;;  %v578_v27 = vld [vmem:[%s1361_s1 + $0x8] sm:$0xff]  ;;  %v569_v28 = vld [vmem:[%s1363_s3] sm:$0xff] }
  0x3e   :  { %932 = vmatpush3.msra.mxu1 %v590_v6  ;;  %955 = vmatprep.mubr.f32.mxu1 %v577_v26  ;;  %v32_v45 = vld [vmem:[#allocation2] sm:$0xff]  ;;  %v33_v52 = vld [vmem:[#allocation2 + $0x8] sm:$0xff] }
  0x3f   :  { %933 = vmatprep.subr.mxu1 %v589_v7  ;;  %v828_v59 = vld [vmem:[%s1365_s5] ss:$0 sm:$0xff] }
  0x40   :  { %888 = vmatpush3.bf16.msra.mxu0 %v1028_v62  ;;  %934 = vmatpush3.msra.mxu1 %v589_v7 }
  0x41   :  { %935 = vmatprep.subr.mxu1 %v588_v8  ;;  %958 = vmatprep.subr.mxu0 %v576_v13 }
  0x42   :  { %936 = vmatpush3.msra.mxu1 %v588_v8 }
  0x43   :  { %551 = vmatmul.mubr.bf16.vlgmr.msra.gmra.mxu0 %v50_v1  ;;  %937 = vmatprep.subr.mxu1 %v587_v10 }
  0x44   :  { %938 = vmatpush3.msra.mxu1 %v587_v10  ;;  %959 = vmatpush3.msra.mxu0 %v576_v13 }
  0x45   :  { %939 = vmatprep.subr.mxu1 %v586_v11  ;;  %960 = vmatprep.subr.mxu0 %v575_v15 }
  0x46   :  { %940 = vmatpush3.msra.mxu1 %v586_v11  ;;  %961 = vmatpush3.msra.mxu0 %v575_v15 }
  0x47   :  { %941 = vmatprep.subr.mxu1 %v585_v12  ;;  %962 = vmatprep.subr.mxu0 %v574_v17 }
  0x48   :  { %942 = vmatpush3.msra.mxu1 %v585_v12  ;;  %963 = vmatpush3.msra.mxu0 %v574_v17 }
  0x49   :  { %943 = vmatprep.subr.mxu1 %v584_v14  ;;  %964 = vmatprep.subr.mxu0 %v573_v19 }
  0x4a   :  { %944 = vmatpush3.msra.mxu1 %v584_v14  ;;  %965 = vmatpush3.msra.mxu0 %v573_v19 }
  0x4b   :  { %945 = vmatprep.subr.mxu1 %v583_v16  ;;  %966 = vmatprep.subr.mxu0 %v572_v21 }
  0x4c   :  { %946 = vmatpush3.msra.mxu1 %v583_v16  ;;  %967 = vmatpush3.msra.mxu0 %v572_v21 }
  0x4d   :  { %947 = vmatprep.subr.mxu1 %v582_v18  ;;  %968 = vmatprep.subr.mxu0 %v571_v23 }
  0x4e   :  { %948 = vmatpush3.msra.mxu1 %v582_v18  ;;  %969 = vmatpush3.msra.mxu0 %v571_v23 }
  0x4f   :  { %949 = vmatprep.subr.mxu1 %v581_v20  ;;  %970 = vmatprep.subr.mxu0 %v570_v25 }
  0x50   :  { %950 = vmatpush3.msra.mxu1 %v581_v20  ;;  %971 = vmatpush3.msra.mxu0 %v570_v25 }
  0x51   :  { %951 = vmatprep.subr.mxu1 %v580_v22  ;;  %972 = vmatprep.subr.mxu0 %v569_v28 }
  0x52   :  { %952 = vmatpush3.msra.mxu1 %v580_v22  ;;  %973 = vmatpush3.msra.mxu0 %v569_v28 }
  0x53   :  { %953 = vmatprep.subr.mxu1 %v579_v24 }
  0x54   :  { %954 = vmatpush3.msra.mxu1 %v579_v24 }
  0x55   :  { %956 = vmatmul.mubr.f32.vlgmr.msra.gmra.mxu1 %v578_v27 }
  0xe3   :  { %v845_v29 = vpop.f32.mrf.mxu0 }
  0xe4   :  { %v867_v30 = vpop.f32.mrf.mxu1 }
  0xe5   :  { %v846_v31 = vpop.f32.mrf.mxu0 }
  0xe6   :  { %v868_v32 = vpop.f32.mrf.mxu1  ;;  %v847_v36 = vadd.f32 %v846_v31, %v845_v29 }
  0xe7   :  { %v848_v33 = vpop.f32.mrf.mxu0  ;;  %v869_v37 = vadd.f32 %v868_v32, %v867_v30 }
  0xe8   :  { %v870_v34 = vpop.f32.mrf.mxu1 }
  0xe9   :  { %v849_v35 = vpop.f32.mrf.mxu0  ;;  %v512_v41 = vadd.f32 %v869_v37, %v847_v36 }
  0xea   :  { %v871_v38 = vpop.f32.mrf.mxu1  ;;  %v850_v42 = vadd.f32 %v849_v35, %v848_v33 }
  0xeb   :  { %v872_v43 = vadd.f32 %v871_v38, %v870_v34 }
  0xed   :  { %v515_v49 = vadd.f32 %v872_v43, %v850_v42 }
 0x103   :  { %v889_v39 = vpop.f32.mrf.mxu0 }
 0x105   :  { %v890_v40 = vpop.f32.mrf.mxu0 }
 0x106   :  { %v891_v44 = vadd.f32 %v890_v40, %v889_v39 }
 0x107   :  { %v892_v46 = vpop.f32.mrf.mxu0 }
 0x108   :  { %v553_v47 = vadd.f32 %v891_v44, %v512_v41 }
 0x109   :  { %v893_v48 = vpop.f32.mrf.mxu0 }
 0x10a   :  { %v559_v50 = vadd.f32 %v553_v47, %v32_v45  ;;  %v894_v51 = vadd.f32 %v893_v48, %v892_v46 }
 0x10c   :  { %562 = vst.msk [vmem:[#allocation2] sm:$0xff] %vm29_vm0, %v559_v50  ;;  %v556_v53 = vadd.f32 %v894_v51, %v515_v49 }
 0x10e   :  { %v560_v54 = vadd.f32 %v556_v53, %v33_v52 }
 0x110   :  { %563 = vst.msk [vmem:[#allocation2 + $0x8] sm:$0xff] %vm29_vm0, %v560_v54 }
 0x113   :  { %v567_v55 = vld [vmem:[#allocation2] sm:$0xff] }
 0x114   :  { %974 = vmatprep.mubr.msk.f32.mxu0 %vm29_vm0, %v567_v55 }
 0x115   :  { %v957_v57 = vpop.f32.mrf.mxu1 }
 0x117   :  { %v568_v56 = vld [vmem:[#allocation2 + $0x8] sm:$0xff]  ;;  %v661_v61 = vpop.f32.mrf.mxu1 }
 0x118   :  { %975 = vmatmul.mubr.msk.f32.vlgmr.msra.gmra.mxu0 %vm29_vm0, %v568_v56 }
 0x1d8   :  { %v976_v58 = vpop.f32.mrf.mxu0 }
 0x1d9   :  { %v748_v60 = vadd.f32 %v976_v58, %v957_v57 }
 0x1da   :  { %v742_v62 = vpop.f32.mrf.mxu0 }
 0x1db   :  { %v759_v63 = vadd.f32 %v828_v59, %v748_v60  ;;  %v743_v0 = vadd.f32 %v742_v62, %v661_v61 }
 0x1dd   :  { %761 = vst [vmem:[#allocation3 + $0x8] sm:$0xff] %v759_v63  ;;  %v758_v1 = vadd.f32 %v828_v59, %v743_v0 }
 0x1df   :  { %760 = vst [vmem:[#allocation3] sm:$0xff] %v758_v1 }
 0x1e0   :  { %1040 = shalt.err (!%p1037_p4)
}
 0x1e1   :  { %s1053_s23 = smov 128   ;;  %s1054_s5 = smov 8  }
 0x1e2   :  { %773 = dma.vmem_to_hbm [thread:$0]  %s768_s21, 256, %s1366_s6, [#allocation4], %s1053_s23, %s1053_s23, %s1054_s5  }
 0x1e3   :  { %1049 = dma.done.wait [#allocation4], 256  }
 0x1e4   :  { %1050 = vsyncadd [#allocation4], 4294967040 }
 0x1e5   :  { %777 = vsyncpa [#allocation4], 1 }

</bundles_post_ra>
